<compile_context>
chip_gen: v6e
topology: v6e:2x2x1
jax: 0.10.0
libtpu: 0.0.40
codegen_flags: <defaults>
</compile_context>

<pallas_src>
import jax
import jax.numpy as jnp
from jax.experimental import pallas as pl
from jax.experimental.pallas import tpu as pltpu

LANE = 128


def fc7_kernel(x_ref,
               w1, b1, w2, b2, w3, b3, w4, b4,
               w5, b5, w6, b6, w7, b7, w8, b8,
               o_ref):
    """Fused 8-layer MLP forward: 7x (linear + relu) + final linear.

    x_ref / w* are bf16 (native MXU input); b* are f32; accumulation is f32.
    """
    h = x_ref[...]  # bf16 [TB, F0_pad]

    def linear_relu(h_bf16, w_ref, b_ref):
        y = jnp.dot(h_bf16, w_ref[...],
                    preferred_element_type=jnp.float32) + b_ref[...]
        # Bias-add + ReLU in f32 (no bf16 VPU path needed on v5e); cast back to
        # bf16 only to feed the next MXU matmul.
        return jnp.maximum(y, 0.0).astype(jnp.bfloat16)

    h = linear_relu(h, w1, b1)
    h = linear_relu(h, w2, b2)
    h = linear_relu(h, w3, b3)
    h = linear_relu(h, w4, b4)
    h = linear_relu(h, w5, b5)
    h = linear_relu(h, w6, b6)
    h = linear_relu(h, w7, b7)

    # Final layer: no ReLU, no dropout.  Lane-dense f32 store.
    y = jnp.dot(h, w8[...], preferred_element_type=jnp.float32) + b8[...]
    o_ref[...] = y.astype(o_ref.dtype)


def _round_up(n, m):
    return ((n + m - 1) // m) * m


def _pad2(a, rows, cols):
    pr, pc = rows - a.shape[0], cols - a.shape[1]
    if pr or pc:
        a = jnp.pad(a, ((0, pr), (0, pc)))
    return a


def fc7_forward(x, params, *, tb=256):
    """x: [B, in_features]; params: list of (W [in,out], b [1,out]) for 8 layers.

    Returns [B, out_features] float32.
    """
    B, f_in = x.shape
    out_features = params[-1][0].shape[1]

    # Padded feature sizes at every layer boundary (lane-dense: multiples of 128).
    dims = [f_in] + [w.shape[1] for (w, _) in params]
    pdims = [_round_up(d, LANE) for d in dims]

    # Batch tiling: pad B to a multiple of 8 (sublane) and tile it over the grid.
    if B <= tb:
        b_pad = _round_up(B, 8)
        tb_eff = b_pad
    else:
        b_pad = _round_up(B, tb)
        tb_eff = tb
    nb = b_pad // tb_eff

    # Pad + cast inputs/weights to bf16; biases stay f32 (bias-add done in f32).
    x_p = _pad2(x, b_pad, pdims[0]).astype(jnp.bfloat16)

    flat = []
    in_specs = [pl.BlockSpec((tb_eff, pdims[0]), lambda i: (i, 0))]
    for li, (w, b) in enumerate(params):
        w_p = _pad2(w, pdims[li], pdims[li + 1]).astype(jnp.bfloat16)
        b_p = _pad2(b.reshape(1, -1), 1, pdims[li + 1]).astype(jnp.float32)
        flat.extend([w_p, b_p])
        # Weights/biases: full-array blocks, resident across the whole batch grid.
        in_specs.append(pl.BlockSpec(w_p.shape, lambda i: (0, 0)))
        in_specs.append(pl.BlockSpec(b_p.shape, lambda i: (0, 0)))

    out_spec = pl.BlockSpec((tb_eff, pdims[-1]), lambda i: (i, 0))

    flops = 2 * b_pad * sum(pdims[i] * pdims[i + 1] for i in range(len(params)))
    bytes_accessed = (x_p.size * x_p.dtype.itemsize
                      + sum(int(a.size) * a.dtype.itemsize for a in flat)
                      + b_pad * pdims[-1] * 4)

    y_p = pl.pallas_call(
        fc7_kernel,
        out_shape=jax.ShapeDtypeStruct((b_pad, pdims[-1]), jnp.float32),
        grid_spec=pltpu.PrefetchScalarGridSpec(
            num_scalar_prefetch=0,
            grid=(nb,),
            in_specs=in_specs,
            out_specs=out_spec,
        ),
        compiler_params=pltpu.CompilerParams(
            dimension_semantics=("parallel",),
        ),
        cost_estimate=pl.CostEstimate(
            flops=flops, transcendentals=0, bytes_accessed=bytes_accessed),
    )(x_p, *flat)

    # Slice padded batch rows / padded output lanes back off.
    return y_p[:B, :out_features]


def init_params(key, dims):
    """dims = [in, h1, ..., h7, out].  Deterministic normal init (f32 masters)."""
    params = []
    for i in range(len(dims) - 1):
        key, kw, kb = jax.random.split(key, 3)
        fan_in = dims[i]
        w = (jax.random.normal(kw, (dims[i], dims[i + 1]), jnp.float32)
             * (1.0 / jnp.sqrt(fan_in)))
        b = jax.random.normal(kb, (1, dims[i + 1]), jnp.float32) * 0.01
        params.append((w, b))
    return params


if __name__ == "__main__":
    key = jax.random.PRNGKey(0)

    # Small shapes consistent with the module: in=32, 7 hidden dims of 32, out=16.
    in_features = 32
    hidden = [32, 32, 32, 32, 32, 32, 32]
    out_features = 16
    batch = 24          # small, but > tile so the batch grid is exercised

    dims = [in_features] + hidden + [out_features]

    key, kx = jax.random.split(key)
    x = jax.random.normal(kx, (batch, in_features), jnp.float32)
    params = init_params(key, dims)

    # tb=8 here only to exercise multiple grid steps at this tiny batch;
    # production default is tb=256.
    y = fc7_forward(x, params, tb=8)
    jax.block_until_ready(y)

    # Pure-JAX reference mirroring the kernel's numerics:
    # bf16 matmul operands, f32 accumulation / bias-add / ReLU.
    h = x.astype(jnp.bfloat16).astype(jnp.float32)
    ref = None
    for i, (w, b) in enumerate(params):
        wf = w.astype(jnp.bfloat16).astype(jnp.float32)
        yy = jnp.dot(h, wf, precision=jax.lax.Precision.HIGHEST) + b
        if i < len(params) - 1:
            h = jnp.maximum(yy, 0.0).astype(jnp.bfloat16).astype(jnp.float32)
        else:
            ref = yy

    assert y.shape == (batch, out_features)
    assert jnp.allclose(y, ref, atol=1e-3, rtol=1e-3), "mismatch vs reference"

    print("KERNEL_OK")
</pallas_src>

<mosaic_0001>
module attributes {stable_mosaic.version = 11 : i64} {
  func.func @fc7_kernel(%arg0: i32, %arg1: memref<8x128xbf16, #tpu.memory_space<vmem>>, %arg2: memref<128x128xbf16, #tpu.memory_space<vmem>>, %arg3: memref<1x128xf32, #tpu.memory_space<vmem>>, %arg4: memref<128x128xbf16, #tpu.memory_space<vmem>>, %arg5: memref<1x128xf32, #tpu.memory_space<vmem>>, %arg6: memref<128x128xbf16, #tpu.memory_space<vmem>>, %arg7: memref<1x128xf32, #tpu.memory_space<vmem>>, %arg8: memref<128x128xbf16, #tpu.memory_space<vmem>>, %arg9: memref<1x128xf32, #tpu.memory_space<vmem>>, %arg10: memref<128x128xbf16, #tpu.memory_space<vmem>>, %arg11: memref<1x128xf32, #tpu.memory_space<vmem>>, %arg12: memref<128x128xbf16, #tpu.memory_space<vmem>>, %arg13: memref<1x128xf32, #tpu.memory_space<vmem>>, %arg14: memref<128x128xbf16, #tpu.memory_space<vmem>>, %arg15: memref<1x128xf32, #tpu.memory_space<vmem>>, %arg16: memref<128x128xbf16, #tpu.memory_space<vmem>>, %arg17: memref<1x128xf32, #tpu.memory_space<vmem>>, %arg18: memref<8x128xf32, #tpu.memory_space<vmem>>) attributes {dimension_semantics = [#tpu.dimension_semantics<parallel>], iteration_bounds = array<i64: 3>, scalar_prefetch = 0 : i64, scratch_operands = 0 : i64, tpu.core_type = #tpu.core_type<tc>, window_params = [{transform_indices = @transform_0, window_bounds = array<i64: 8, 128>}, {pipeline_mode = #tpu.pipeline_mode<synchronous>, transform_indices = @transform_1, window_bounds = array<i64: 128, 128>}, {pipeline_mode = #tpu.pipeline_mode<synchronous>, transform_indices = @transform_2, window_bounds = array<i64: 1, 128>}, {pipeline_mode = #tpu.pipeline_mode<synchronous>, transform_indices = @transform_3, window_bounds = array<i64: 128, 128>}, {pipeline_mode = #tpu.pipeline_mode<synchronous>, transform_indices = @transform_4, window_bounds = array<i64: 1, 128>}, {pipeline_mode = #tpu.pipeline_mode<synchronous>, transform_indices = @transform_5, window_bounds = array<i64: 128, 128>}, {pipeline_mode = #tpu.pipeline_mode<synchronous>, transform_indices = @transform_6, window_bounds = array<i64: 1, 128>}, {pipeline_mode = #tpu.pipeline_mode<synchronous>, transform_indices = @transform_7, window_bounds = array<i64: 128, 128>}, {pipeline_mode = #tpu.pipeline_mode<synchronous>, transform_indices = @transform_8, window_bounds = array<i64: 1, 128>}, {pipeline_mode = #tpu.pipeline_mode<synchronous>, transform_indices = @transform_9, window_bounds = array<i64: 128, 128>}, {pipeline_mode = #tpu.pipeline_mode<synchronous>, transform_indices = @transform_10, window_bounds = array<i64: 1, 128>}, {pipeline_mode = #tpu.pipeline_mode<synchronous>, transform_indices = @transform_11, window_bounds = array<i64: 128, 128>}, {pipeline_mode = #tpu.pipeline_mode<synchronous>, transform_indices = @transform_12, window_bounds = array<i64: 1, 128>}, {pipeline_mode = #tpu.pipeline_mode<synchronous>, transform_indices = @transform_13, window_bounds = array<i64: 128, 128>}, {pipeline_mode = #tpu.pipeline_mode<synchronous>, transform_indices = @transform_14, window_bounds = array<i64: 1, 128>}, {pipeline_mode = #tpu.pipeline_mode<synchronous>, transform_indices = @transform_15, window_bounds = array<i64: 128, 128>}, {pipeline_mode = #tpu.pipeline_mode<synchronous>, transform_indices = @transform_16, window_bounds = array<i64: 1, 128>}, {transform_indices = @transform_17, window_bounds = array<i64: 8, 128>}]} {
    %c0 = arith.constant 0 : index
    %c0_0 = arith.constant 0 : index
    %0 = vector.load %arg1[%c0, %c0_0] : memref<8x128xbf16, #tpu.memory_space<vmem>>, vector<8x128xbf16>
    %c0_1 = arith.constant 0 : index
    %c0_2 = arith.constant 0 : index
    %1 = vector.load %arg2[%c0_1, %c0_2] : memref<128x128xbf16, #tpu.memory_space<vmem>>, vector<128x128xbf16>
    %cst = arith.constant dense<0.000000e+00> : vector<8x128xf32>
    %2 = tpu.matmul %0, %1, %cst {dimension_numbers = #tpu.dot_dimension_numbers<[1], [0], [0], [1], [0, 0, 1, 1], [], []>} : vector<8x128xbf16>, vector<128x128xbf16>, vector<8x128xf32> -> vector<8x128xf32>
    %c0_3 = arith.constant 0 : index
    %c0_4 = arith.constant 0 : index
    %3 = vector.load %arg3[%c0_3, %c0_4] : memref<1x128xf32, #tpu.memory_space<vmem>>, vector<1x128xf32>
    %4 = vector.broadcast %3 : vector<1x128xf32> to vector<8x128xf32>
    %5 = arith.addf %2, %4 : vector<8x128xf32>
    %cst_5 = arith.constant 0.000000e+00 : f32
    %6 = vector.broadcast %cst_5 : f32 to vector<8x128xf32>
    %7 = arith.maximumf %5, %6 : vector<8x128xf32>
    %8 = arith.truncf %7 : vector<8x128xf32> to vector<8x128xbf16>
    %c0_6 = arith.constant 0 : index
    %c0_7 = arith.constant 0 : index
    %9 = vector.load %arg4[%c0_6, %c0_7] : memref<128x128xbf16, #tpu.memory_space<vmem>>, vector<128x128xbf16>
    %cst_8 = arith.constant dense<0.000000e+00> : vector<8x128xf32>
    %10 = tpu.matmul %8, %9, %cst_8 {dimension_numbers = #tpu.dot_dimension_numbers<[1], [0], [0], [1], [0, 0, 1, 1], [], []>} : vector<8x128xbf16>, vector<128x128xbf16>, vector<8x128xf32> -> vector<8x128xf32>
    %c0_9 = arith.constant 0 : index
    %c0_10 = arith.constant 0 : index
    %11 = vector.load %arg5[%c0_9, %c0_10] : memref<1x128xf32, #tpu.memory_space<vmem>>, vector<1x128xf32>
    %12 = vector.broadcast %11 : vector<1x128xf32> to vector<8x128xf32>
    %13 = arith.addf %10, %12 : vector<8x128xf32>
    %cst_11 = arith.constant 0.000000e+00 : f32
    %14 = vector.broadcast %cst_11 : f32 to vector<8x128xf32>
    %15 = arith.maximumf %13, %14 : vector<8x128xf32>
    %16 = arith.truncf %15 : vector<8x128xf32> to vector<8x128xbf16>
    %c0_12 = arith.constant 0 : index
    %c0_13 = arith.constant 0 : index
    %17 = vector.load %arg6[%c0_12, %c0_13] : memref<128x128xbf16, #tpu.memory_space<vmem>>, vector<128x128xbf16>
    %cst_14 = arith.constant dense<0.000000e+00> : vector<8x128xf32>
    %18 = tpu.matmul %16, %17, %cst_14 {dimension_numbers = #tpu.dot_dimension_numbers<[1], [0], [0], [1], [0, 0, 1, 1], [], []>} : vector<8x128xbf16>, vector<128x128xbf16>, vector<8x128xf32> -> vector<8x128xf32>
    %c0_15 = arith.constant 0 : index
    %c0_16 = arith.constant 0 : index
    %19 = vector.load %arg7[%c0_15, %c0_16] : memref<1x128xf32, #tpu.memory_space<vmem>>, vector<1x128xf32>
    %20 = vector.broadcast %19 : vector<1x128xf32> to vector<8x128xf32>
    %21 = arith.addf %18, %20 : vector<8x128xf32>
    %cst_17 = arith.constant 0.000000e+00 : f32
    %22 = vector.broadcast %cst_17 : f32 to vector<8x128xf32>
    %23 = arith.maximumf %21, %22 : vector<8x128xf32>
    %24 = arith.truncf %23 : vector<8x128xf32> to vector<8x128xbf16>
    %c0_18 = arith.constant 0 : index
    %c0_19 = arith.constant 0 : index
    %25 = vector.load %arg8[%c0_18, %c0_19] : memref<128x128xbf16, #tpu.memory_space<vmem>>, vector<128x128xbf16>
    %cst_20 = arith.constant dense<0.000000e+00> : vector<8x128xf32>
    %26 = tpu.matmul %24, %25, %cst_20 {dimension_numbers = #tpu.dot_dimension_numbers<[1], [0], [0], [1], [0, 0, 1, 1], [], []>} : vector<8x128xbf16>, vector<128x128xbf16>, vector<8x128xf32> -> vector<8x128xf32>
    %c0_21 = arith.constant 0 : index
    %c0_22 = arith.constant 0 : index
    %27 = vector.load %arg9[%c0_21, %c0_22] : memref<1x128xf32, #tpu.memory_space<vmem>>, vector<1x128xf32>
    %28 = vector.broadcast %27 : vector<1x128xf32> to vector<8x128xf32>
    %29 = arith.addf %26, %28 : vector<8x128xf32>
    %cst_23 = arith.constant 0.000000e+00 : f32
    %30 = vector.broadcast %cst_23 : f32 to vector<8x128xf32>
    %31 = arith.maximumf %29, %30 : vector<8x128xf32>
    %32 = arith.truncf %31 : vector<8x128xf32> to vector<8x128xbf16>
    %c0_24 = arith.constant 0 : index
    %c0_25 = arith.constant 0 : index
    %33 = vector.load %arg10[%c0_24, %c0_25] : memref<128x128xbf16, #tpu.memory_space<vmem>>, vector<128x128xbf16>
    %cst_26 = arith.constant dense<0.000000e+00> : vector<8x128xf32>
    %34 = tpu.matmul %32, %33, %cst_26 {dimension_numbers = #tpu.dot_dimension_numbers<[1], [0], [0], [1], [0, 0, 1, 1], [], []>} : vector<8x128xbf16>, vector<128x128xbf16>, vector<8x128xf32> -> vector<8x128xf32>
    %c0_27 = arith.constant 0 : index
    %c0_28 = arith.constant 0 : index
    %35 = vector.load %arg11[%c0_27, %c0_28] : memref<1x128xf32, #tpu.memory_space<vmem>>, vector<1x128xf32>
    %36 = vector.broadcast %35 : vector<1x128xf32> to vector<8x128xf32>
    %37 = arith.addf %34, %36 : vector<8x128xf32>
    %cst_29 = arith.constant 0.000000e+00 : f32
    %38 = vector.broadcast %cst_29 : f32 to vector<8x128xf32>
    %39 = arith.maximumf %37, %38 : vector<8x128xf32>
    %40 = arith.truncf %39 : vector<8x128xf32> to vector<8x128xbf16>
    %c0_30 = arith.constant 0 : index
    %c0_31 = arith.constant 0 : index
    %41 = vector.load %arg12[%c0_30, %c0_31] : memref<128x128xbf16, #tpu.memory_space<vmem>>, vector<128x128xbf16>
    %cst_32 = arith.constant dense<0.000000e+00> : vector<8x128xf32>
    %42 = tpu.matmul %40, %41, %cst_32 {dimension_numbers = #tpu.dot_dimension_numbers<[1], [0], [0], [1], [0, 0, 1, 1], [], []>} : vector<8x128xbf16>, vector<128x128xbf16>, vector<8x128xf32> -> vector<8x128xf32>
    %c0_33 = arith.constant 0 : index
    %c0_34 = arith.constant 0 : index
    %43 = vector.load %arg13[%c0_33, %c0_34] : memref<1x128xf32, #tpu.memory_space<vmem>>, vector<1x128xf32>
    %44 = vector.broadcast %43 : vector<1x128xf32> to vector<8x128xf32>
    %45 = arith.addf %42, %44 : vector<8x128xf32>
    %cst_35 = arith.constant 0.000000e+00 : f32
    %46 = vector.broadcast %cst_35 : f32 to vector<8x128xf32>
    %47 = arith.maximumf %45, %46 : vector<8x128xf32>
    %48 = arith.truncf %47 : vector<8x128xf32> to vector<8x128xbf16>
    %c0_36 = arith.constant 0 : index
    %c0_37 = arith.constant 0 : index
    %49 = vector.load %arg14[%c0_36, %c0_37] : memref<128x128xbf16, #tpu.memory_space<vmem>>, vector<128x128xbf16>
    %cst_38 = arith.constant dense<0.000000e+00> : vector<8x128xf32>
    %50 = tpu.matmul %48, %49, %cst_38 {dimension_numbers = #tpu.dot_dimension_numbers<[1], [0], [0], [1], [0, 0, 1, 1], [], []>} : vector<8x128xbf16>, vector<128x128xbf16>, vector<8x128xf32> -> vector<8x128xf32>
    %c0_39 = arith.constant 0 : index
    %c0_40 = arith.constant 0 : index
    %51 = vector.load %arg15[%c0_39, %c0_40] : memref<1x128xf32, #tpu.memory_space<vmem>>, vector<1x128xf32>
    %52 = vector.broadcast %51 : vector<1x128xf32> to vector<8x128xf32>
    %53 = arith.addf %50, %52 : vector<8x128xf32>
    %cst_41 = arith.constant 0.000000e+00 : f32
    %54 = vector.broadcast %cst_41 : f32 to vector<8x128xf32>
    %55 = arith.maximumf %53, %54 : vector<8x128xf32>
    %56 = arith.truncf %55 : vector<8x128xf32> to vector<8x128xbf16>
    %c0_42 = arith.constant 0 : index
    %c0_43 = arith.constant 0 : index
    %57 = vector.load %arg16[%c0_42, %c0_43] : memref<128x128xbf16, #tpu.memory_space<vmem>>, vector<128x128xbf16>
    %cst_44 = arith.constant dense<0.000000e+00> : vector<8x128xf32>
    %58 = tpu.matmul %56, %57, %cst_44 {dimension_numbers = #tpu.dot_dimension_numbers<[1], [0], [0], [1], [0, 0, 1, 1], [], []>} : vector<8x128xbf16>, vector<128x128xbf16>, vector<8x128xf32> -> vector<8x128xf32>
    %c0_45 = arith.constant 0 : index
    %c0_46 = arith.constant 0 : index
    %59 = vector.load %arg17[%c0_45, %c0_46] : memref<1x128xf32, #tpu.memory_space<vmem>>, vector<1x128xf32>
    %60 = vector.broadcast %59 : vector<1x128xf32> to vector<8x128xf32>
    %61 = arith.addf %58, %60 : vector<8x128xf32>
    %c0_47 = arith.constant 0 : index
    %c0_48 = arith.constant 0 : index
    %62 = vector.load %arg18[%c0_47, %c0_48] : memref<8x128xf32, #tpu.memory_space<vmem>>, vector<8x128xf32>
    tpu.vector_store %arg18[%c0_47, %c0_48], %61 {strides = array<i32>} : memref<8x128xf32, #tpu.memory_space<vmem>>, vector<8x128xf32>,
    return
  }
  func.func @transform_0(%arg0: i32) -> (i32, i32) {
    %c0_i32 = arith.constant 0 : i32
    %c0_i32_0 = arith.constant 0 : i32
    return %arg0, %c0_i32 : i32, i32
  }
  func.func @transform_1(%arg0: i32) -> (i32, i32) {
    %c0_i32 = arith.constant 0 : i32
    %c0_i32_0 = arith.constant 0 : i32
    %c0_i32_1 = arith.constant 0 : i32
    return %c0_i32, %c0_i32_0 : i32, i32
  }
  func.func @transform_2(%arg0: i32) -> (i32, i32) {
    %c0_i32 = arith.constant 0 : i32
    %c0_i32_0 = arith.constant 0 : i32
    %c0_i32_1 = arith.constant 0 : i32
    return %c0_i32, %c0_i32_0 : i32, i32
  }
  func.func @transform_3(%arg0: i32) -> (i32, i32) {
    %c0_i32 = arith.constant 0 : i32
    %c0_i32_0 = arith.constant 0 : i32
    %c0_i32_1 = arith.constant 0 : i32
    return %c0_i32, %c0_i32_0 : i32, i32
  }
  func.func @transform_4(%arg0: i32) -> (i32, i32) {
    %c0_i32 = arith.constant 0 : i32
    %c0_i32_0 = arith.constant 0 : i32
    %c0_i32_1 = arith.constant 0 : i32
    return %c0_i32, %c0_i32_0 : i32, i32
  }
  func.func @transform_5(%arg0: i32) -> (i32, i32) {
    %c0_i32 = arith.constant 0 : i32
    %c0_i32_0 = arith.constant 0 : i32
    %c0_i32_1 = arith.constant 0 : i32
    return %c0_i32, %c0_i32_0 : i32, i32
  }
  func.func @transform_6(%arg0: i32) -> (i32, i32) {
    %c0_i32 = arith.constant 0 : i32
    %c0_i32_0 = arith.constant 0 : i32
    %c0_i32_1 = arith.constant 0 : i32
    return %c0_i32, %c0_i32_0 : i32, i32
  }
  func.func @transform_7(%arg0: i32) -> (i32, i32) {
    %c0_i32 = arith.constant 0 : i32
    %c0_i32_0 = arith.constant 0 : i32
    %c0_i32_1 = arith.constant 0 : i32
    return %c0_i32, %c0_i32_0 : i32, i32
  }
  func.func @transform_8(%arg0: i32) -> (i32, i32) {
    %c0_i32 = arith.constant 0 : i32
    %c0_i32_0 = arith.constant 0 : i32
    %c0_i32_1 = arith.constant 0 : i32
    return %c0_i32, %c0_i32_0 : i32, i32
  }
  func.func @transform_9(%arg0: i32) -> (i32, i32) {
    %c0_i32 = arith.constant 0 : i32
    %c0_i32_0 = arith.constant 0 : i32
    %c0_i32_1 = arith.constant 0 : i32
    return %c0_i32, %c0_i32_0 : i32, i32
  }
  func.func @transform_10(%arg0: i32) -> (i32, i32) {
    %c0_i32 = arith.constant 0 : i32
    %c0_i32_0 = arith.constant 0 : i32
    %c0_i32_1 = arith.constant 0 : i32
    return %c0_i32, %c0_i32_0 : i32, i32
  }
  func.func @transform_11(%arg0: i32) -> (i32, i32) {
    %c0_i32 = arith.constant 0 : i32
    %c0_i32_0 = arith.constant 0 : i32
    %c0_i32_1 = arith.constant 0 : i32
    return %c0_i32, %c0_i32_0 : i32, i32
  }
  func.func @transform_12(%arg0: i32) -> (i32, i32) {
    %c0_i32 = arith.constant 0 : i32
    %c0_i32_0 = arith.constant 0 : i32
    %c0_i32_1 = arith.constant 0 : i32
    return %c0_i32, %c0_i32_0 : i32, i32
  }
  func.func @transform_13(%arg0: i32) -> (i32, i32) {
    %c0_i32 = arith.constant 0 : i32
    %c0_i32_0 = arith.constant 0 : i32
    %c0_i32_1 = arith.constant 0 : i32
    return %c0_i32, %c0_i32_0 : i32, i32
  }
  func.func @transform_14(%arg0: i32) -> (i32, i32) {
    %c0_i32 = arith.constant 0 : i32
    %c0_i32_0 = arith.constant 0 : i32
    %c0_i32_1 = arith.constant 0 : i32
    return %c0_i32, %c0_i32_0 : i32, i32
  }
  func.func @transform_15(%arg0: i32) -> (i32, i32) {
    %c0_i32 = arith.constant 0 : i32
    %c0_i32_0 = arith.constant 0 : i32
    %c0_i32_1 = arith.constant 0 : i32
    return %c0_i32, %c0_i32_0 : i32, i32
  }
  func.func @transform_16(%arg0: i32) -> (i32, i32) {
    %c0_i32 = arith.constant 0 : i32
    %c0_i32_0 = arith.constant 0 : i32
    %c0_i32_1 = arith.constant 0 : i32
    return %c0_i32, %c0_i32_0 : i32, i32
  }
  func.func @transform_17(%arg0: i32) -> (i32, i32) {
    %c0_i32 = arith.constant 0 : i32
    %c0_i32_0 = arith.constant 0 : i32
    return %arg0, %c0_i32 : i32, i32
  }
}

</mosaic_0001>

<bundles_post_ra>
// kernel: tpu_custom_call.1
= control target key start
LH: loop header
LB: loop body
LE: loop exit
PB: predicated region body
PF: predicated region fallthrough
CT: control target
= control target key end

     0   :  { %s3075_s0 = inlined_call_operand.hbm [shape: bf16[24,128], index: 0, kind: input, shape index: {}]   ;;  %s3076_s1 = inlined_call_operand.hbm [shape: bf16[128,128], index: 1, kind: input, shape index: {}]   ;;  %s3077_s2 = inlined_call_operand.vmem [shape: f32[1,128], index: 2, kind: input, shape index: {}]   ;;  %s3078_s3 = inlined_call_operand.hbm [shape: bf16[128,128], index: 3, kind: input, shape index: {}]   ;;  %s3079_s4 = inlined_call_operand.vmem [shape: f32[1,128], index: 4, kind: input, shape index: {}]   ;;  %s3080_s5 = inlined_call_operand.hbm [shape: bf16[128,128], index: 5, kind: input, shape index: {}]   ;;  %s3081_s6 = inlined_call_operand.vmem [shape: f32[1,128], index: 6, kind: input, shape index: {}]   ;;  %s3082_s7 = inlined_call_operand.hbm [shape: bf16[128,128], index: 7, kind: input, shape index: {}]   ;;  %s3083_s8 = inlined_call_operand.vmem [shape: f32[1,128], index: 8, kind: input, shape index: {}]   ;;  %s3084_s9 = inlined_call_operand.hbm [shape: bf16[128,128], index: 9, kind: input, shape index: {}]   ;;  %s3085_s10 = inlined_call_operand.vmem [shape: f32[1,128], index: 10, kind: input, shape index: {}]   ;;  %s3086_s11 = inlined_call_operand.hbm [shape: bf16[128,128], index: 11, kind: input, shape index: {}]   ;;  %s3087_s12 = inlined_call_operand.vmem [shape: f32[1,128], index: 12, kind: input, shape index: {}]   ;;  %s3088_s13 = inlined_call_operand.hbm [shape: bf16[128,128], index: 13, kind: input, shape index: {}]   ;;  %s3089_s14 = inlined_call_operand.vmem [shape: f32[1,128], index: 14, kind: input, shape index: {}]   ;;  %s3090_s15 = inlined_call_operand.hbm [shape: bf16[128,128], index: 15, kind: input, shape index: {}]   ;;  %s3091_s16 = inlined_call_operand.vmem [shape: f32[1,128], index: 16, kind: input, shape index: {}]   ;;  %s3092_s17 = inlined_call_operand.hbm [shape: f32[24,128], index: 17, kind: output, shape index: {}]  }
   0x1   :  { %3099 = sst [smem:[#allocation25_spill]] %s3075_s0 }
   0x2   :  { %3100 = sst [smem:[#allocation26_spill]] %s3076_s1 }
   0x3   :  { %3101 = sst [smem:[#allocation27_spill]] %s3078_s3 }
   0x4   :  { %3102 = sst [smem:[#allocation28_spill]] %s3080_s5 }
   0x5   :  { %3103 = sst [smem:[#allocation29_spill]] %s3082_s7 }
   0x6   :  { %3104 = sst [smem:[#allocation30_spill]] %s3084_s9 }
   0x7   :  { %3105 = sst [smem:[#allocation31_spill]] %s3086_s11 }
   0x8   :  { %3106 = sst [smem:[#allocation32_spill]] %s3088_s13 }
   0x9   :  { %3107 = sst [smem:[#allocation33_spill]] %s3089_s14 }
   0xa   :  { %3108 = sst [smem:[#allocation34_spill]] %s3090_s15 }
   0xb   :  { %3109 = sst [smem:[#allocation35_spill]] %s3091_s16 }
   0xc   :  { %3110 = sst [smem:[#allocation36_spill]] %s3092_s17 }
   0xd   :  { %22 = vsyncpa [#allocation3], 0 }
   0xe   :  { %24 = vsyncpa [#allocation3 + $0x1], 0 }
   0xf   :  { %25 = vsyncpa [#allocation6], 0 }
  0x10   :  { %26 = vsyncpa [#allocation9], 0 }
  0x11   :  { %27 = vsyncpa [#allocation12], 0 }
  0x12   :  { %28 = vsyncpa [#allocation15], 0 }
  0x13   :  { %29 = vsyncpa [#allocation4], 0 }
  0x14   :  { %31 = vsyncpa [#allocation4 + $0x1], 0  ;;  %s2694_s24 = smov 0   ;;  %s2696_s25 = smov 0  }
  0x15   :  { %s2698_s26 = smov 0   ;;  %s2700_s27 = smov 0  }
  0x16 LB: > { %s2590_s28 = smov [#allocation5]   ;;  %s2715_s0 = sadd.s32 4294967295, %s2588_s27   ;;  %s2588_s27 = sphi %s2700_s27, %s3148_s27   ;;  %s2584_s26 = sphi %s2698_s26, %s3147_s26   ;;  %s2580_s25 = sphi %s2696_s25, %s3146_s25   ;;  %s2576_s24 = sphi %s2694_s24, %s3145_s24  }
  0x17   : > { %s442_s29 = sshll.u32 %s2590_s28, 4  ;;  %p1746_p0 = scmp.ge.s32.totalorder %s2588_s27, 1  ;;  %s443_s29 = int_to_ptr.vmem [resolvable:$true] %s442_s29 }
  0x18   : > { %p3095_p1 = scmp.eq.s32.totalorder %s2715_s0, 0  ;;  %p430_p2 = scmp.lt.s32.totalorder %s2588_s27, 4 }
  0x19   : > { %s2591_s18 = smov [#allocation8]   ;;  %s2592_s20 = smov [#allocation11]  }
  0x1a   : > { %p2720_p3 = pnand %p1746_p0, %p430_p2  ;;  %s474_s19 = sshll.u32 %s2591_s18, 4  ;;  %s2732_s19 = int_to_ptr.vmem [resolvable:$true] %s474_s19 }
  0x1b   : > { %s506_s21 = sshll.u32 %s2592_s20, 4  ;;  %s2283_s23 = scalar_lea.vmem %s443_s29, 1024  ;;  %s2734_s21 = int_to_ptr.vmem [resolvable:$true] %s506_s21 }
  0x1c   : > { %s3111_s30 = scalar_select %p2720_p3, 1, 0 }
  0x1d   : > { %p2113_p4 = pneg %p2720_p3  ;;  %p2284_p7 = scmp.ne.s32.totalorder %s443_s29, %s2283_s23 }
  0x1e   : > { %p2291_p10 = scmp.lt.s32.totalorder %s443_s29, %s443_s29  ;;  %p2292_p11 = scmp.lt.s32.totalorder %s2283_s23, %s2283_s23 }
  0x1f   : > { %p2728_p5 = pnand %p2113_p4, %p3095_p1 }
  0x20   : > { %p2293_p12 = por %p2292_p11, %p2291_p10 }
  0x21   : > { %p2738_p6 = pneg %p2728_p5 }
  0x23   : > { %p2286_p8 = pnand %p2284_p7, %p2738_p6 }
  0x25   : > { %p2287_p9 = pneg %p2286_p8 }
  0x27   : > { %p2294_p13 = pnand %p2293_p12, %p2287_p9 }
  0x29   : > { %2297 = shalt.err (!%p2294_p13)
}
  0x2a   : > { %s2593_s28 = smov 64   ;;  %s2594_s18 = smov 4  }
  0x2b   : > { %s3114_s16 = sld [smem:[#allocation26_spill]]  ;;  %s2309_s14 = scalar_lea.vmem %s2732_s19, 1024 }
  0x2c   : > { %p2310_p0 = scmp.ne.s32.totalorder %s2732_s19, %s2309_s14  ;;  %p2317_p7 = scmp.lt.s32.totalorder %s2732_s19, %s2732_s19 }
  0x2d   : > { %p2318_p8 = scmp.lt.s32.totalorder %s2309_s14, %s2309_s14 }
  0x2e   : > { %p2312_p2 = pnand %p2310_p0, %p2738_p6 }
  0x2f   : > { %p2319_p9 = por %p2318_p8, %p2317_p7 }
  0x30   : > { %p2313_p4 = pneg %p2312_p2 }
  0x31   : > { %2116 = dma.hbm_to_vmem [thread:$0]  (!%p2728_p5), %s3114_s16, 1024, %s443_s29, [#allocation6], %s2593_s28, %s2593_s28, %s2594_s18  }
  0x32   : > { %p2320_p10 = pnand %p2319_p9, %p2313_p4 }
  0x34   : > { %2323 = shalt.err (!%p2320_p10)
}
  0x35   : > { %s3115_s5 = sld [smem:[#allocation28_spill]]  ;;  %s2335_s16 = scalar_lea.vmem %s2734_s21, 1024 }
  0x36   : > { %p2336_p11 = scmp.ne.s32.totalorder %s2734_s21, %s2335_s16  ;;  %p2343_p0 = scmp.lt.s32.totalorder %s2734_s21, %s2734_s21 }
  0x37   : > { %p2344_p2 = scmp.lt.s32.totalorder %s2335_s16, %s2335_s16 }
  0x38   : > { %p2338_p12 = pnand %p2336_p11, %p2738_p6 }
  0x39   : > { %p2345_p4 = por %p2344_p2, %p2343_p0 }
  0x3a   : > { %p2339_p13 = pneg %p2338_p12 }
  0x3b   : > { %2122 = dma.hbm_to_vmem [thread:$0]  (!%p2728_p5), %s3115_s5, 1024, %s2732_s19, [#allocation9], %s2593_s28, %s2593_s28, %s2594_s18  }
  0x3c   : > { %p2346_p7 = pnand %p2345_p4, %p2339_p13 }
  0x3e   : > { %2349 = shalt.err (!%p2346_p7)
}
  0x3f   : > { %s3116_s9 = sld [smem:[#allocation30_spill]]  ;;  %s2595_s19 = smov [#allocation14]  }
  0x40   : > { %s538_s20 = sshll.u32 %s2595_s19, 4  ;;  %s2596_s23 = smov [#allocation7]   ;;  %s539_s20 = int_to_ptr.vmem [resolvable:$true] %s538_s20 }
  0x41   : > { %s458_s17 = sshll.u32 %s2596_s23, 4  ;;  %s2361_s16 = scalar_lea.vmem %s539_s20, 1024  ;;  %s459_s17 = int_to_ptr.vmem [resolvable:$true] %s458_s17 }
  0x42   : > { %p2362_p8 = scmp.ne.s32.totalorder %s539_s20, %s2361_s16  ;;  %p2369_p11 = scmp.lt.s32.totalorder %s539_s20, %s539_s20 }
  0x43   : > { %p2370_p12 = scmp.lt.s32.totalorder %s2361_s16, %s2361_s16 }
  0x44   : > { %p2364_p9 = pnand %p2362_p8, %p2738_p6 }
  0x45   : > { %2128 = dma.hbm_to_vmem [thread:$0]  (!%p2728_p5), %s3116_s9, 1024, %s2734_s21, [#allocation12], %s2593_s28, %s2593_s28, %s2594_s18  }
  0x46   : > { %p2365_p10 = pneg %p2364_p9  ;;  %p2371_p13 = por %p2370_p12, %p2369_p11 }
  0x48   : > { %p2372_p0 = pnand %p2371_p13, %p2365_p10 }
  0x4a   : > { %2375 = shalt.err (!%p2372_p0)
}
  0x4b   : > { %s3117_s13 = sld [smem:[#allocation32_spill]]  ;;  %s2387_s29 = scalar_lea.vmem %s459_s17, 1024 }
  0x4c   : > { %p2388_p2 = scmp.ne.s32.totalorder %s459_s17, %s2387_s29  ;;  %p2395_p8 = scmp.lt.s32.totalorder %s459_s17, %s459_s17 }
  0x4d   : > { %p2396_p9 = scmp.lt.s32.totalorder %s2387_s29, %s2387_s29 }
  0x4e   : > { %p2390_p4 = pnand %p2388_p2, %p2738_p6 }
  0x4f   : > { %p2397_p10 = por %p2396_p9, %p2395_p8 }
  0x50   : > { %p2391_p7 = pneg %p2390_p4 }
  0x51   : > { %2134 = dma.hbm_to_vmem [thread:$0]  (!%p2728_p5), %s3117_s13, 1024, %s539_s20, [#allocation15], %s2593_s28, %s2593_s28, %s2594_s18  }
  0x52   : > { %p2398_p11 = pnand %p2397_p10, %p2391_p7 }
  0x54   : > { %2401 = shalt.err (!%p2398_p11)
}
  0x55   : > { %s3118_s3 = sld [smem:[#allocation27_spill]]  ;;  %s2597_s20 = smov [#allocation10]  }
  0x56   : > { %s490_s16 = sshll.u32 %s2597_s20, 4  ;;  %s2598_s21 = smov [#allocation13]   ;;  %s491_s16 = int_to_ptr.vmem [resolvable:$true] %s490_s16 }
  0x57   : > { %s522_s14 = sshll.u32 %s2598_s21, 4  ;;  %s2413_s5 = scalar_lea.vmem %s491_s16, 1024  ;;  %s523_s14 = int_to_ptr.vmem [resolvable:$true] %s522_s14 }
  0x58   : > { %p2414_p12 = scmp.ne.s32.totalorder %s491_s16, %s2413_s5  ;;  %p2421_p2 = scmp.lt.s32.totalorder %s491_s16, %s491_s16 }
  0x59   : > { %p2422_p4 = scmp.lt.s32.totalorder %s2413_s5, %s2413_s5 }
  0x5a   : > { %p2416_p13 = pnand %p2414_p12, %p2738_p6 }
  0x5b   : > { %2119 = dma.hbm_to_vmem [thread:$0]  (!%p2728_p5), %s3118_s3, 1024, %s459_s17, [#allocation6], %s2593_s28, %s2593_s28, %s2594_s18  }
  0x5c   : > { %p2417_p0 = pneg %p2416_p13  ;;  %p2423_p7 = por %p2422_p4, %p2421_p2 }
  0x5e   : > { %p2424_p8 = pnand %p2423_p7, %p2417_p0 }
  0x60   : > { %2427 = shalt.err (!%p2424_p8)
}
  0x61   : > { %s3119_s7 = sld [smem:[#allocation29_spill]]  ;;  %s2439_s19 = scalar_lea.vmem %s523_s14, 1024 }
  0x62   : > { %p2440_p9 = scmp.ne.s32.totalorder %s523_s14, %s2439_s19  ;;  %p2447_p12 = scmp.lt.s32.totalorder %s523_s14, %s523_s14 }
  0x63   : > { %p2448_p13 = scmp.lt.s32.totalorder %s2439_s19, %s2439_s19 }
  0x64   : > { %p2442_p10 = pnand %p2440_p9, %p2738_p6 }
  0x65   : > { %p2449_p0 = por %p2448_p13, %p2447_p12 }
  0x66   : > { %p2443_p11 = pneg %p2442_p10 }
  0x67   : > { %2125 = dma.hbm_to_vmem [thread:$0]  (!%p2728_p5), %s3119_s7, 1024, %s491_s16, [#allocation9], %s2593_s28, %s2593_s28, %s2594_s18  }
  0x68   : > { %p2450_p2 = pnand %p2449_p0, %p2443_p11 }
  0x6a   : > { %2453 = shalt.err (!%p2450_p2)
}
  0x6b   : > { %s3120_s11 = sld [smem:[#allocation31_spill]]  ;;  %s2599_s20 = smov [#allocation16]  }
  0x6c   : > { %s554_s16 = sshll.u32 %s2599_s20, 4  ;;  %s555_s16 = int_to_ptr.vmem [resolvable:$true] %s554_s16 }
  0x6d   : > { %s2465_s21 = scalar_lea.vmem %s555_s16, 1024  ;;  %p2473_p9 = scmp.lt.s32.totalorder %s555_s16, %s555_s16 }
  0x6e   : > { %p2466_p4 = scmp.ne.s32.totalorder %s555_s16, %s2465_s21  ;;  %p2474_p10 = scmp.lt.s32.totalorder %s2465_s21, %s2465_s21 }
  0x70   : > { %p2468_p7 = pnand %p2466_p4, %p2738_p6  ;;  %p2475_p11 = por %p2474_p10, %p2473_p9 }
  0x71   : > { %2131 = dma.hbm_to_vmem [thread:$0]  (!%p2728_p5), %s3120_s11, 1024, %s523_s14, [#allocation12], %s2593_s28, %s2593_s28, %s2594_s18  }
  0x72   : > { %p2469_p8 = pneg %p2468_p7 }
  0x74   : > { %p2476_p12 = pnand %p2475_p11, %p2469_p8 }
  0x76   : > { %2479 = shalt.err (!%p2476_p12)
}
  0x77   : > { %s3121_s15 = sld [smem:[#allocation34_spill]]  ;;  %s1745_s1 = sadd.s32 4294967294, %s2588_s27  }
  0x78   : > { %s2834_s22 = sadd.s32 1, %s2588_s27   ;;  %s44_s19 = sadd.s32 1, %s2584_s26 }
  0x79   : > { %s41_s29 = ssub.s32 %s2588_s27, %s2834_s22  ;;  %p51_p13 = scmp.ne.s32.totalorder %s2584_s26, %s2580_s25 }
  0x7a   : > { %p42_p6 = scmp.eq.s32.totalorder %s41_s29, 0  ;;  %p52_p0 = scmp.eq.s32.totalorder %s2588_s27, 0 }
  0x7b   : > { %p57_p2 = scmp.ne.s32.totalorder %s2580_s25, %s2576_s24  ;;  %p417_p7 = scmp.eq.s32.totalorder %s2715_s0, 2 }
  0x7c   : > { %s2845_s5 = scalar_select %p42_p6, %s2584_s26, %s44_s19  }
  0x7d   : > { %2137 = dma.hbm_to_vmem [thread:$0]  (!%p2728_p5), %s3121_s15, 1024, %s555_s16, [#allocation15], %s2593_s28, %s2593_s28, %s2594_s18  }
  0x7e   : > { %3122 = sst [smem:[#allocation24_spill]] %s2845_s5  ;;  %p2847_p4 = por %p52_p0, %p51_p13 }
  0x7f   : > { %p2853_p5 = por %p3095_p1, %p57_p2  ;;  %p423_p8 = scmp.eq.s32.totalorder %s1745_s1, 2 }
  0x80   : > { %p2154_p9 = scmp.lt.s32.totalorder %s2588_s27, 3  ;;  %s571_s18 = sand.u32 1, %s2584_s26  }
  0x81   : > { %s3124_s28 = scalar_select %p2853_p5, 1, 0 }
  0x82   : > { %p2860_p10 = por %p417_p7, %p51_p13  ;;  %p2864_p11 = por %p423_p8, %p57_p2 }
  0x83   : > { %s1756_s21 = sshll.u32 %s571_s18, 2  ;;  %s1757_s17 = sshll.u32 %s2588_s27, 6 }
  0x84   : > { %s3125_s20 = scalar_select %p2860_p10, 1, 0 }
  0x85   : > { %s3126_s16 = scalar_select %p2864_p11, 1, 0 }
  0x86   : > { %s3127_s19 = sld [smem:[#allocation25_spill]]  ;;  %s575_s1 = scalar_lea.vmem [#allocation2], %s1756_s21 }
  0x87   : > { %s582_s7 = sshll.u32 %s575_s1, 4  ;;  %p2876_p12 = pnand %p2154_p9, %p2847_p4  ;;  %s583_s7 = int_to_ptr.vmem [resolvable:$true] %s582_s7 }
  0x88   : > { %s572_s11 = scalar_lea.sflag [#allocation3], %s571_s18 }
  0x89   : > { %p2482_p13 = pneg %p2876_p12 }
  0x8c   : > { %s2872_s3 = scalar_lea.hbm %s3127_s19, %s1757_s17  ;;  %s2485_s29 = scalar_lea.hbm %s3127_s19, 192 }
  0x8d   : > { %s2480_s13 = scalar_lea.hbm %s2872_s3, 64  ;;  %p2486_p7 = scmp.lt.s32.totalorder %s2872_s3, %s3127_s19 }
  0x8e   : > { %p2481_p6 = scmp.ne.s32.totalorder %s2872_s3, %s2480_s13  ;;  %p2487_p4 = scmp.lt.s32.totalorder %s2485_s29, %s2480_s13 }
  0x90   : > { %p2483_p0 = pnand %p2482_p13, %p2481_p6  ;;  %p2488_p8 = por %p2487_p4, %p2486_p7 }
  0x92   : > { %p2484_p2 = pneg %p2483_p0 }
  0x94   : > { %p2489_p9 = pnand %p2488_p8, %p2484_p2 }
  0x96   : > { %2492 = shalt.err (!%p2489_p9)
}
  0x97   : > { %s2493_s23 = scalar_lea.vmem %s583_s7, 64  ;;  %s2600_s18 = smov [#allocation2]  }
  0x98   : > { %p2494_p1 = scmp.ne.s32.totalorder %s583_s7, %s2493_s23  ;;  %s2498_s15 = sshll.u32 %s2600_s18, 4  ;;  %s2499_s15 = int_to_ptr.vmem [resolvable:$false] %s2498_s15 }
  0x99   : > { %s2500_s5 = scalar_lea.vmem %s2499_s15, 128  ;;  %p2501_p6 = scmp.lt.s32.totalorder %s583_s7, %s2499_s15 }
  0x9a   : > { %p2496_p11 = pnand %p2494_p1, %p2482_p13  ;;  %p2502_p0 = scmp.lt.s32.totalorder %s2500_s5, %s2493_s23 }
  0x9c   : > { %p2497_p10 = pneg %p2496_p11  ;;  %p2503_p5 = por %p2502_p0, %p2501_p6 }
  0x9e   : > { %p2504_p3 = pnand %p2503_p5, %p2497_p10 }
  0xa0   : > { %2507 = shalt.err (!%p2504_p3)
}
  0xa1   : > { %2141 = dma.hbm_to_vmem [thread:$0]  (!%p2876_p12), %s2872_s3, 64, %s583_s7, %s572_s11  }
  0xa2   : > { %p3129_p2 = scmp.ne.s32.totalorder %s3111_s30, 0 }
  0xa3   : > { %s2897_s13 = sand.u32 (!%p3129_p2), 1, %s2580_s25   ;;  %p3130_p1 = scmp.ne.s32.totalorder (!%p3129_p2), %s3124_s28, 0 }
  0xa4   : > { %591 = sbr.rel (%p3129_p2) target bundleno = 1818 (0x71a), region = 88  ;;  %s1759_s17 = sshll.u32 (!%p3129_p2), %s2897_s13, 2 }
  0xa5   : > { %s594_s14 = scalar_lea.sflag (!%p3129_p2), [#allocation3], %s2897_s13  ;;  %s2901_s15 = scalar_lea.vmem (!%p3129_p2), [#allocation2], %s1759_s17 }
  0xa9   : > { %2551 = dma.done.wait (%p3130_p1), %s594_s14, 64  }
  0xaa   : > { %2553 = vsyncadd (%p3130_p1), %s594_s14, 4294967232  ;;  %p3131_p3 = scmp.eq.s32.totalorder %s2715_s0, 0 }
  0xac   : > { %2555 = dma.done.wait (%p3131_p3), [#allocation6], 2048   ;;  %p3132_p5 = pmov %p3131_p3 }
  0xad   : > { %p3133_p10 = pmov %p3131_p3 }
  0xae   : > { %2557 = vsyncadd (%p3132_p5), [#allocation6], 4294965248 }
  0xaf   : > { %2559 = dma.done.wait (%p3133_p10), [#allocation9], 2048   ;;  %p3134_p11 = pmov %p3131_p3 }
  0xb0   : > { %p3135_p12 = pmov %p3131_p3 }
  0xb1   : > { %2561 = vsyncadd (%p3134_p11), [#allocation9], 4294965248 }
  0xb2   : > { %2563 = dma.done.wait (%p3135_p12), [#allocation12], 2048   ;;  %p3136_p13 = pmov %p3131_p3 }
  0xb3   : > { %p3137_p7 = pmov %p3131_p3 }
  0xb4   : > { %2565 = vsyncadd (%p3136_p13), [#allocation12], 4294965248 }
  0xb5   : > { %2567 = dma.done.wait (%p3137_p7), [#allocation15], 2048   ;;  %p3138_p4 = pmov %p3131_p3 }
  0xb6   : > { %v2601_v0 = vmov 0.0   ;;  %vm2602_vm0 = vmmov 0   ;;  %v2208_v1 = vld [vmem:[#allocation5 + $0x38] sm:$0xff]   ;;  %v2209_v2 = vld [vmem:[#allocation5 + $0x30] sm:$0xff]   ;;  %v2210_v3 = vld [vmem:[#allocation5 + $0x28] sm:$0xff]   ;;  %s1768_s3 = sshll.u32 %s2897_s13, 3 }
  0xb7   : > { %2569 = vsyncadd (%p3138_p4), [#allocation15], 4294965248  ;;  %1917 = vmatprep.subr.bf16.mxu0 %v2601_v0  ;;  %1933 = vmatprep.mubr.msk.bf16.mxu0 %vm2602_vm0, %v2601_v0  ;;  %v2216_v4 = vld [vmem:[#allocation7 + $0x38] sm:$0xff]   ;;  %v2211_v5 = vld [vmem:[#allocation5 + $0x20] sm:$0xff]   ;;  %s3140_s11 = sld [smem:[#allocation35_spill]]  ;;  %s1842_s30 = sshll.u32 %s2715_s0, 7 }
  0xb8   : > { %1937 = vmatprep.subr.bf16.mxu1 %v2601_v0  ;;  %1953 = vmatprep.mubr.msk.bf16.mxu1 %vm2602_vm0, %v2601_v0  ;;  %v2217_v6 = vld [vmem:[#allocation7 + $0x30] sm:$0xff]   ;;  %v2212_v7 = vld [vmem:[#allocation5 + $0x18] sm:$0xff]   ;;  %v2218_v8 = vld [vmem:[#allocation7 + $0x28] sm:$0xff]   ;;  %s679_s5 = scalar_lea.vmem [#allocation17], %s1768_s3  ;;  %s3141_s1 = sld [smem:[#allocation36_spill]] }
  0xb9   : > { %1918 = vmatpush3.bf16.msra.mxu0 %v2208_v1  ;;  %1938 = vmatpush3.bf16.msra.mxu1 %v2216_v4  ;;  %v2213_v9 = vld [vmem:[#allocation5 + $0x10] sm:$0xff]   ;;  %v2219_v10 = vld [vmem:[#allocation7 + $0x20] sm:$0xff]   ;;  %v2214_v11 = vld [vmem:[#allocation5 + $0x8] sm:$0xff]   ;;  %s1599_s28 = sshll.u32 %s679_s5, 4  ;;  %s1586_s18 = scalar_lea.sflag [#allocation4], %s2897_s13  ;;  %s3035_s28 = int_to_ptr.vmem [resolvable:$true] %s1599_s28 }
  0xba   : > { %1919 = vmatprep.subr.bf16.mxu0 %v2601_v0  ;;  %1939 = vmatprep.subr.bf16.mxu1 %v2601_v0  ;;  %v2220_v12 = vld [vmem:[#allocation7 + $0x18] sm:$0xff]   ;;  %v2215_v13 = vld [vmem:[#allocation5] sm:$0xff]   ;;  %v2221_v14 = vld [vmem:[#allocation7 + $0x10] sm:$0xff]   ;;  %s2508_s17 = scalar_lea.vmem %s3035_s28, 128  ;;  %p3142_p9 = scmp.ne.s32.totalorder %s3125_s20, 0 }
  0xbb   : > { %v681_v15 = vld [vmem:[%s2901_s15] sm:$0xf]  ;;  %v2222_v16 = vld [vmem:[#allocation7 + $0x8] sm:$0xff]   ;;  %v2223_v17 = vld [vmem:[#allocation7] sm:$0xff]   ;;  %s3139_s15 = sld [smem:[#allocation33_spill]]  ;;  %p2509_p8 = scmp.ne.s32.totalorder %s3035_s28, %s2508_s17 }
  0xbc   : > { %v2224_v18 = vld [vmem:[#allocation8 + $0x38] sm:$0xff]   ;;  %v2225_v19 = vld [vmem:[#allocation8 + $0x30] sm:$0xff]   ;;  %v2226_v20 = vld [vmem:[#allocation8 + $0x28] sm:$0xff]   ;;  %s2603_s0 = smov [#allocation17]  }
  0xbd   : > { %1920 = vmatpush3.bf16.msra.mxu0 %v2209_v2  ;;  %1940 = vmatpush3.bf16.msra.mxu1 %v2217_v6  ;;  %v2227_v21 = vld [vmem:[#allocation8 + $0x20] sm:$0xff]   ;;  %v2228_v22 = vld [vmem:[#allocation8 + $0x18] sm:$0xff]   ;;  %v2229_v23 = vld [vmem:[#allocation8 + $0x10] sm:$0xff]   ;;  %p2510_p6 = pnand %p2509_p8, %p3142_p9  ;;  %s2512_s14 = sshll.u32 %s2603_s0, 4  ;;  %s2513_s14 = int_to_ptr.vmem [resolvable:$false] %s2512_s14 }
  0xbe   : > { %1921 = vmatprep.subr.bf16.mxu0 %v2601_v0  ;;  %1941 = vmatprep.subr.bf16.mxu1 %v2601_v0  ;;  %v1769_v24 = vld [vmem:[%s3077_s2] ss:$0 sm:$0xff]  ;;  %v2230_v32 = vld [vmem:[#allocation8 + $0x8] sm:$0xff]   ;;  %v2231_v33 = vld [vmem:[#allocation8] sm:$0xff]   ;;  %s3033_s23 = scalar_lea.hbm %s3141_s1, %s1842_s30  ;;  %p2515_p2 = scmp.lt.s32.totalorder %s3035_s28, %s2513_s14 }
  0xbf   : > { %v2232_v34 = vld [vmem:[#allocation10 + $0x38] sm:$0xff]   ;;  %v2233_v35 = vld [vmem:[#allocation10 + $0x30] sm:$0xff]   ;;  %v2234_v36 = vld [vmem:[#allocation10 + $0x28] sm:$0xff]   ;;  %p2511_p0 = pneg %p2510_p6 }
  0xc0   : > { %v2235_v37 = vld [vmem:[#allocation10 + $0x20] sm:$0xff]   ;;  %v2236_v38 = vld [vmem:[#allocation10 + $0x18] sm:$0xff]   ;;  %v2237_v39 = vld [vmem:[#allocation10 + $0x10] sm:$0xff]  }
  0xc1   : > { %1922 = vmatpush3.bf16.msra.mxu0 %v2210_v3  ;;  %1942 = vmatpush3.bf16.msra.mxu1 %v2218_v8  ;;  %v1778_v40 = vld [vmem:[%s3079_s4] ss:$0 sm:$0xff]  ;;  %v2238_v48 = vld [vmem:[#allocation10 + $0x8] sm:$0xff]   ;;  %v2239_v49 = vld [vmem:[#allocation10] sm:$0xff]  }
  0xc2   : > { %1923 = vmatprep.subr.bf16.mxu0 %v2601_v0  ;;  %1943 = vmatprep.subr.bf16.mxu1 %v2601_v0  ;;  %v2240_v50 = vld [vmem:[#allocation11 + $0x38] sm:$0xff]   ;;  %v2241_v51 = vld [vmem:[#allocation11 + $0x30] sm:$0xff]   ;;  %v2242_v52 = vld [vmem:[#allocation11 + $0x28] sm:$0xff]  }
  0xc3   : > { %v2243_v53 = vld [vmem:[#allocation11 + $0x20] sm:$0xff]   ;;  %v2244_v54 = vld [vmem:[#allocation11 + $0x18] sm:$0xff]   ;;  %v2245_v55 = vld [vmem:[#allocation11 + $0x10] sm:$0xff]  }
  0xc4   : > { %v1787_v56 = vld [vmem:[%s3081_s6] ss:$0 sm:$0xff]  ;;  %v2246_v1 = vld [vmem:[#allocation11 + $0x8] sm:$0xff]   ;;  %v2247_v2 = vld [vmem:[#allocation11] sm:$0xff]  }
  0xc5   : > { %1924 = vmatpush3.bf16.msra.mxu0 %v2211_v5  ;;  %1944 = vmatpush3.bf16.msra.mxu1 %v2219_v10  ;;  %v2248_v3 = vld [vmem:[#allocation13 + $0x38] sm:$0xff]   ;;  %v2249_v4 = vld [vmem:[#allocation13 + $0x30] sm:$0xff]   ;;  %v2250_v5 = vld [vmem:[#allocation13 + $0x28] sm:$0xff]  }
  0xc6   : > { %1925 = vmatprep.subr.bf16.mxu0 %v2601_v0  ;;  %1945 = vmatprep.subr.bf16.mxu1 %v2601_v0  ;;  %v2251_v6 = vld [vmem:[#allocation13 + $0x20] sm:$0xff]   ;;  %v2253_v8 = vld [vmem:[#allocation13 + $0x10] sm:$0xff]  }
  0xc9   : > { %1926 = vmatpush3.bf16.msra.mxu0 %v2212_v7  ;;  %1946 = vmatpush3.bf16.msra.mxu1 %v2220_v12  ;;  %v2252_v7 = vld [vmem:[#allocation13 + $0x18] sm:$0xff]  }
  0xca   : > { %1927 = vmatprep.subr.bf16.mxu0 %v2601_v0  ;;  %1947 = vmatprep.subr.bf16.mxu1 %v2601_v0 }
  0xcd   : > { %1928 = vmatpush3.bf16.msra.mxu0 %v2213_v9  ;;  %1948 = vmatpush3.bf16.msra.mxu1 %v2221_v14  ;;  %v1796_v9 = vld [vmem:[%s3083_s8] ss:$0 sm:$0xff] }
  0xce   : > { %1929 = vmatprep.subr.bf16.mxu0 %v2601_v0  ;;  %1949 = vmatprep.subr.bf16.mxu1 %v2601_v0 }
  0xd1   : > { %1930 = vmatpush3.bf16.msra.mxu0 %v2214_v11  ;;  %1950 = vmatpush3.bf16.msra.mxu1 %v2222_v16 }
  0xd2   : > { %1931 = vmatprep.subr.bf16.mxu0 %v2601_v0  ;;  %1951 = vmatprep.subr.bf16.mxu1 %v2601_v0 }
  0xd5   : > { %1932 = vmatpush3.bf16.msra.mxu0 %v2215_v13  ;;  %1952 = vmatpush3.bf16.msra.mxu1 %v2223_v17  ;;  %v2254_v17 = vld [vmem:[#allocation13 + $0x8] sm:$0xff]  }
  0xd6   : > { %1957 = vmatprep.subr.bf16.mxu0 %v2601_v0  ;;  %1977 = vmatprep.subr.bf16.mxu1 %v2601_v0 }
  0xd8   : > { %1934 = vmatmul.mubr.bf16.vlgmr.msra.gmra.mxu0 %v681_v15 }
  0xd9   : > { %1973 = vmatprep.mubr.msk.bf16.mxu0 %vm2602_vm0, %v2601_v0  ;;  %1958 = vmatpush3.bf16.msra.mxu0 %v2224_v18  ;;  %v2255_v18 = vld [vmem:[#allocation13] sm:$0xff]  }
  0xda   : > { %1959 = vmatprep.subr.bf16.mxu0 %v2601_v0 }
  0xdd   : > { %1960 = vmatpush3.bf16.msra.mxu0 %v2225_v19  ;;  %v2256_v19 = vld [vmem:[#allocation14 + $0x38] sm:$0xff]  }
  0xde   : > { %1961 = vmatprep.subr.bf16.mxu0 %v2601_v0 }
  0xe1   : > { %1962 = vmatpush3.bf16.msra.mxu0 %v2226_v20  ;;  %v2257_v20 = vld [vmem:[#allocation14 + $0x30] sm:$0xff]  }
  0xe2   : > { %1963 = vmatprep.subr.bf16.mxu0 %v2601_v0 }
  0xe5   : > { %1964 = vmatpush3.bf16.msra.mxu0 %v2227_v21  ;;  %v2258_v21 = vld [vmem:[#allocation14 + $0x28] sm:$0xff]  }
  0xe6   : > { %1965 = vmatprep.subr.bf16.mxu0 %v2601_v0 }
  0xe9   : > { %1966 = vmatpush3.bf16.msra.mxu0 %v2228_v22  ;;  %v2259_v22 = vld [vmem:[#allocation14 + $0x20] sm:$0xff]  }
  0xea   : > { %1967 = vmatprep.subr.bf16.mxu0 %v2601_v0 }
  0xed   : > { %1968 = vmatpush3.bf16.msra.mxu0 %v2229_v23  ;;  %v2260_v23 = vld [vmem:[#allocation14 + $0x18] sm:$0xff]  }
  0xee   : > { %1969 = vmatprep.subr.bf16.mxu0 %v2601_v0 }
  0xf1   : > { %1970 = vmatpush3.bf16.msra.mxu0 %v2230_v32 }
  0xf2   : > { %1971 = vmatprep.subr.bf16.mxu0 %v2601_v0 }
  0xf5   : > { %1972 = vmatpush3.bf16.msra.mxu0 %v2231_v33  ;;  %v2262_v33 = vld [vmem:[#allocation14 + $0x8] sm:$0xff]  }
  0xf6   : > { %1997 = vmatprep.subr.bf16.mxu0 %v2601_v0 }
 0x198   : > { %v787_v25 = vpop.f32.mrf.mxu0 }
 0x199   : > { %v788_v26 = vadd.f32 %v1769_v24, %v787_v25  ;;  %v2261_v24 = vld [vmem:[#allocation14 + $0x10] sm:$0xff]   ;;  %v1805_v25 = vld [vmem:[%s3085_s10] ss:$0 sm:$0xff] }
 0x19a   : > { %v1935_v27 = vpop.f32.mrf.mxu0 }
 0x19b   : > { %v793_v28 = vmax.f32 %v788_v26, 0.0 }
 0x19c   : > { %v790_v29 = vpop.f32.mrf.mxu0 }
 0x19d   : > { %v794_v30 = vpack.c.bf16 %v793_v28, %v793_v28 }
 0x19e   : > { %v1936_v31 = vpop.f32.mrf.mxu0 }
 0x19f   : > { %1954 = vmatmul.mubr.bf16.vlgmr.msra.gmra.mxu1 %v794_v30 }
 0x1a0   : > { %1993 = vmatprep.mubr.msk.bf16.mxu1 %vm2602_vm0, %v2601_v0  ;;  %1978 = vmatpush3.bf16.msra.mxu1 %v2232_v34  ;;  %v2263_v34 = vld [vmem:[#allocation14] sm:$0xff]  }
 0x1a1   : > { %1979 = vmatprep.subr.bf16.mxu1 %v2601_v0 }
 0x1a4   : > { %1980 = vmatpush3.bf16.msra.mxu1 %v2233_v35  ;;  %v2264_v35 = vld [vmem:[#allocation16 + $0x38] sm:$0xff]  }
 0x1a5   : > { %1981 = vmatprep.subr.bf16.mxu1 %v2601_v0 }
 0x1a8   : > { %1982 = vmatpush3.bf16.msra.mxu1 %v2234_v36  ;;  %v2265_v36 = vld [vmem:[#allocation16 + $0x30] sm:$0xff]  }
 0x1a9   : > { %1983 = vmatprep.subr.bf16.mxu1 %v2601_v0 }
 0x1ac   : > { %1984 = vmatpush3.bf16.msra.mxu1 %v2235_v37  ;;  %v2266_v37 = vld [vmem:[#allocation16 + $0x28] sm:$0xff]  }
 0x1ad   : > { %1985 = vmatprep.subr.bf16.mxu1 %v2601_v0 }
 0x1b0   : > { %1986 = vmatpush3.bf16.msra.mxu1 %v2236_v38  ;;  %v2267_v38 = vld [vmem:[#allocation16 + $0x20] sm:$0xff]  }
 0x1b1   : > { %1987 = vmatprep.subr.bf16.mxu1 %v2601_v0 }
 0x1b4   : > { %1988 = vmatpush3.bf16.msra.mxu1 %v2237_v39  ;;  %v2268_v39 = vld [vmem:[#allocation16 + $0x18] sm:$0xff]  }
 0x1b5   : > { %1989 = vmatprep.subr.bf16.mxu1 %v2601_v0 }
 0x1b8   : > { %1990 = vmatpush3.bf16.msra.mxu1 %v2238_v48 }
 0x1b9   : > { %1991 = vmatprep.subr.bf16.mxu1 %v2601_v0 }
 0x1bc   : > { %1992 = vmatpush3.bf16.msra.mxu1 %v2239_v49  ;;  %v2270_v49 = vld [vmem:[#allocation16 + $0x8] sm:$0xff]  }
 0x1bd   : > { %2017 = vmatprep.subr.bf16.mxu1 %v2601_v0 }
 0x25f   : > { %v900_v41 = vpop.f32.mrf.mxu1 }
 0x260   : > { %v901_v42 = vadd.f32 %v1778_v40, %v900_v41  ;;  %v2269_v40 = vld [vmem:[#allocation16 + $0x10] sm:$0xff]   ;;  %v1814_v41 = vld [vmem:[%s3087_s12] ss:$0 sm:$0xff] }
 0x261   : > { %v1955_v43 = vpop.f32.mrf.mxu1 }
 0x262   : > { %v906_v44 = vmax.f32 %v901_v42, 0.0 }
 0x263   : > { %v903_v45 = vpop.f32.mrf.mxu1 }
 0x264   : > { %v907_v46 = vpack.c.bf16 %v906_v44, %v906_v44 }
 0x265   : > { %v1956_v47 = vpop.f32.mrf.mxu1 }
 0x266   : > { %1974 = vmatmul.mubr.bf16.vlgmr.msra.gmra.mxu0 %v907_v46 }
 0x267   : > { %2013 = vmatprep.mubr.msk.bf16.mxu0 %vm2602_vm0, %v2601_v0  ;;  %1998 = vmatpush3.bf16.msra.mxu0 %v2240_v50  ;;  %v2271_v50 = vld [vmem:[#allocation16] sm:$0xff]  }
 0x268   : > { %1999 = vmatprep.subr.bf16.mxu0 %v2601_v0 }
 0x26b   : > { %2000 = vmatpush3.bf16.msra.mxu0 %v2241_v51  ;;  %v1823_v51 = vld [vmem:[%s3139_s15] ss:$0 sm:$0xff]  ;;  %s2514_s15 = scalar_lea.vmem %s2513_s14, 256 }
 0x26c   : > { %2001 = vmatprep.subr.bf16.mxu0 %v2601_v0  ;;  %p2516_p1 = scmp.lt.s32.totalorder %s2514_s15, %s2508_s17 }
 0x26e   : > { %p2517_p3 = por %p2516_p1, %p2515_p2 }
 0x26f   : > { %2002 = vmatpush3.bf16.msra.mxu0 %v2242_v52 }
 0x270   : > { %2003 = vmatprep.subr.bf16.mxu0 %v2601_v0  ;;  %p2518_p5 = pnand %p2517_p3, %p2511_p0 }
 0x273   : > { %2004 = vmatpush3.bf16.msra.mxu0 %v2243_v53 }
 0x274   : > { %2005 = vmatprep.subr.bf16.mxu0 %v2601_v0 }
 0x277   : > { %2006 = vmatpush3.bf16.msra.mxu0 %v2244_v54 }
 0x278   : > { %2007 = vmatprep.subr.bf16.mxu0 %v2601_v0 }
 0x27b   : > { %2008 = vmatpush3.bf16.msra.mxu0 %v2245_v55 }
 0x27c   : > { %2009 = vmatprep.subr.bf16.mxu0 %v2601_v0 }
 0x27f   : > { %2010 = vmatpush3.bf16.msra.mxu0 %v2246_v1 }
 0x280   : > { %2011 = vmatprep.subr.bf16.mxu0 %v2601_v0 }
 0x283   : > { %2012 = vmatpush3.bf16.msra.mxu0 %v2247_v2 }
 0x284   : > { %2037 = vmatprep.subr.bf16.mxu0 %v2601_v0 }
 0x326   : > { %v1013_v57 = vpop.f32.mrf.mxu0 }
 0x327   : > { %v1014_v58 = vadd.f32 %v1787_v56, %v1013_v57 }
 0x328   : > { %v1975_v59 = vpop.f32.mrf.mxu0 }
 0x329   : > { %v1019_v60 = vmax.f32 %v1014_v58, 0.0 }
 0x32a   : > { %v1016_v61 = vpop.f32.mrf.mxu0 }
 0x32b   : > { %v1020_v62 = vpack.c.bf16 %v1019_v60, %v1019_v60 }
 0x32c   : > { %v1976_v63 = vpop.f32.mrf.mxu0 }
 0x32d   : > { %1994 = vmatmul.mubr.bf16.vlgmr.msra.gmra.mxu1 %v1020_v62 }
 0x32e   : > { %2033 = vmatprep.mubr.msk.bf16.mxu1 %vm2602_vm0, %v2601_v0  ;;  %2018 = vmatpush3.bf16.msra.mxu1 %v2248_v3 }
 0x32f   : > { %2019 = vmatprep.subr.bf16.mxu1 %v2601_v0 }
 0x332   : > { %2020 = vmatpush3.bf16.msra.mxu1 %v2249_v4 }
 0x333   : > { %2021 = vmatprep.subr.bf16.mxu1 %v2601_v0 }
 0x336   : > { %2022 = vmatpush3.bf16.msra.mxu1 %v2250_v5 }
 0x337   : > { %2023 = vmatprep.subr.bf16.mxu1 %v2601_v0 }
 0x33a   : > { %2024 = vmatpush3.bf16.msra.mxu1 %v2251_v6 }
 0x33b   : > { %2025 = vmatprep.subr.bf16.mxu1 %v2601_v0 }
 0x33e   : > { %2026 = vmatpush3.bf16.msra.mxu1 %v2252_v7 }
 0x33f   : > { %2027 = vmatprep.subr.bf16.mxu1 %v2601_v0 }
 0x342   : > { %2028 = vmatpush3.bf16.msra.mxu1 %v2253_v8 }
 0x343   : > { %2029 = vmatprep.subr.bf16.mxu1 %v2601_v0 }
 0x346   : > { %2030 = vmatpush3.bf16.msra.mxu1 %v2254_v17 }
 0x347   : > { %2031 = vmatprep.subr.bf16.mxu1 %v2601_v0 }
 0x34a   : > { %2032 = vmatpush3.bf16.msra.mxu1 %v2255_v18 }
 0x34b   : > { %2057 = vmatprep.subr.bf16.mxu1 %v2601_v0 }
 0x3ed   : > { %v1126_v10 = vpop.f32.mrf.mxu1 }
 0x3ee   : > { %v1127_v11 = vadd.f32 %v1796_v9, %v1126_v10 }
 0x3ef   : > { %v1995_v12 = vpop.f32.mrf.mxu1 }
 0x3f0   : > { %v1132_v13 = vmax.f32 %v1127_v11, 0.0 }
 0x3f1   : > { %v1129_v14 = vpop.f32.mrf.mxu1 }
 0x3f2   : > { %v1133_v15 = vpack.c.bf16 %v1132_v13, %v1132_v13 }
 0x3f3   : > { %v1996_v16 = vpop.f32.mrf.mxu1 }
 0x3f4   : > { %2014 = vmatmul.mubr.bf16.vlgmr.msra.gmra.mxu0 %v1133_v15 }
 0x3f5   : > { %2053 = vmatprep.mubr.msk.bf16.mxu0 %vm2602_vm0, %v2601_v0  ;;  %2038 = vmatpush3.bf16.msra.mxu0 %v2256_v19 }
 0x3f6   : > { %2039 = vmatprep.subr.bf16.mxu0 %v2601_v0 }
 0x3f9   : > { %2040 = vmatpush3.bf16.msra.mxu0 %v2257_v20 }
 0x3fa   : > { %2041 = vmatprep.subr.bf16.mxu0 %v2601_v0 }
 0x3fd   : > { %2042 = vmatpush3.bf16.msra.mxu0 %v2258_v21 }
 0x3fe   : > { %2043 = vmatprep.subr.bf16.mxu0 %v2601_v0 }
 0x401   : > { %2044 = vmatpush3.bf16.msra.mxu0 %v2259_v22 }
 0x402   : > { %2045 = vmatprep.subr.bf16.mxu0 %v2601_v0 }
 0x405   : > { %2046 = vmatpush3.bf16.msra.mxu0 %v2260_v23 }
 0x406   : > { %2047 = vmatprep.subr.bf16.mxu0 %v2601_v0 }
 0x409   : > { %2048 = vmatpush3.bf16.msra.mxu0 %v2261_v24 }
 0x40a   : > { %2049 = vmatprep.subr.bf16.mxu0 %v2601_v0 }
 0x40d   : > { %2050 = vmatpush3.bf16.msra.mxu0 %v2262_v33 }
 0x40e   : > { %2051 = vmatprep.subr.bf16.mxu0 %v2601_v0 }
 0x411   : > { %2052 = vmatpush3.bf16.msra.mxu0 %v2263_v34 }
 0x4b4   : > { %v1239_v26 = vpop.f32.mrf.mxu0 }
 0x4b5   : > { %v1240_v27 = vadd.f32 %v1805_v25, %v1239_v26 }
 0x4b6   : > { %v2015_v28 = vpop.f32.mrf.mxu0 }
 0x4b7   : > { %v1245_v29 = vmax.f32 %v1240_v27, 0.0 }
 0x4b8   : > { %v1242_v30 = vpop.f32.mrf.mxu0 }
 0x4b9   : > { %v1246_v31 = vpack.c.bf16 %v1245_v29, %v1245_v29 }
 0x4ba   : > { %v2016_v32 = vpop.f32.mrf.mxu0 }
 0x4bb   : > { %2034 = vmatmul.mubr.bf16.vlgmr.msra.gmra.mxu1 %v1246_v31 }
 0x4bc   : > { %2073 = vmatprep.mubr.msk.bf16.mxu1 %vm2602_vm0, %v2601_v0  ;;  %2058 = vmatpush3.bf16.msra.mxu1 %v2264_v35 }
 0x4bd   : > { %2059 = vmatprep.subr.bf16.mxu1 %v2601_v0 }
 0x4c0   : > { %2060 = vmatpush3.bf16.msra.mxu1 %v2265_v36 }
 0x4c1   : > { %2061 = vmatprep.subr.bf16.mxu1 %v2601_v0 }
 0x4c4   : > { %2062 = vmatpush3.bf16.msra.mxu1 %v2266_v37 }
 0x4c5   : > { %2063 = vmatprep.subr.bf16.mxu1 %v2601_v0 }
 0x4c8   : > { %2064 = vmatpush3.bf16.msra.mxu1 %v2267_v38 }
 0x4c9   : > { %2065 = vmatprep.subr.bf16.mxu1 %v2601_v0 }
 0x4cc   : > { %2066 = vmatpush3.bf16.msra.mxu1 %v2268_v39 }
 0x4cd   : > { %2067 = vmatprep.subr.bf16.mxu1 %v2601_v0 }
 0x4d0   : > { %2068 = vmatpush3.bf16.msra.mxu1 %v2269_v40 }
 0x4d1   : > { %2069 = vmatprep.subr.bf16.mxu1 %v2601_v0 }
 0x4d4   : > { %2070 = vmatpush3.bf16.msra.mxu1 %v2270_v49 }
 0x4d5   : > { %2071 = vmatprep.subr.bf16.mxu1 %v2601_v0  ;;  %v1832_v0 = vld [vmem:[%s3140_s11] ss:$0 sm:$0xff] }
 0x4d8   : > { %2072 = vmatpush3.bf16.msra.mxu1 %v2271_v50 }
 0x57b   : > { %v1352_v42 = vpop.f32.mrf.mxu1 }
 0x57c   : > { %v1353_v43 = vadd.f32 %v1814_v41, %v1352_v42 }
 0x57d   : > { %v2035_v44 = vpop.f32.mrf.mxu1 }
 0x57e   : > { %v1358_v45 = vmax.f32 %v1353_v43, 0.0 }
 0x57f   : > { %v1355_v46 = vpop.f32.mrf.mxu1 }
 0x580   : > { %v1359_v47 = vpack.c.bf16 %v1358_v45, %v1358_v45 }
 0x581   : > { %v2036_v48 = vpop.f32.mrf.mxu1 }
 0x582   : > { %2054 = vmatmul.mubr.bf16.vlgmr.msra.gmra.mxu0 %v1359_v47 }
 0x642   : > { %v1465_v52 = vpop.f32.mrf.mxu0 }
 0x643   : > { %v1466_v53 = vadd.f32 %v1823_v51, %v1465_v52 }
 0x644   : > { %v2055_v54 = vpop.f32.mrf.mxu0 }
 0x645   : > { %v1471_v55 = vmax.f32 %v1466_v53, 0.0 }
 0x646   : > { %v1468_v56 = vpop.f32.mrf.mxu0 }
 0x647   : > { %v1472_v57 = vpack.c.bf16 %v1471_v55, %v1471_v55 }
 0x648   : > { %v2056_v58 = vpop.f32.mrf.mxu0 }
 0x649   : > { %2074 = vmatmul.mubr.bf16.vlgmr.msra.gmra.mxu1 %v1472_v57 }
 0x709   : > { %v1578_v59 = vpop.f32.mrf.mxu1 }
 0x70a   : > { %v1579_v60 = vadd.f32 %v1832_v0, %v1578_v59 }
 0x70b   : > { %v2075_v61 = vpop.f32.mrf.mxu1 }
 0x70c   : > { %1584 = vst [vmem:[%s679_s5] sm:$0xff] %v1579_v60 }
 0x70d   : > { %v1581_v62 = vpop.f32.mrf.mxu1 }
 0x70e   : > { %2521 = shalt.err (!%p2518_p5)
}
 0x70f   : > { %s2522_s3 = scalar_lea.hbm %s3033_s23, 128  ;;  %s2526_s9 = scalar_lea.hbm %s3141_s1, 384 }
 0x710   : > { %p2523_p10 = scmp.ne.s32.totalorder %s3033_s23, %s2522_s3  ;;  %p2527_p13 = scmp.lt.s32.totalorder %s3033_s23, %s3141_s1 }
 0x711   : > { %p2528_p7 = scmp.lt.s32.totalorder %s2526_s9, %s2522_s3 }
 0x712   : > { %p2524_p11 = pnand %p2523_p10, %p3142_p9 }
 0x713   : > { %p2529_p4 = por %p2528_p7, %p2527_p13 }
 0x714   : > { %p2525_p12 = pneg %p2524_p11 }
 0x716   : > { %p2530_p8 = pnand %p2529_p4, %p2525_p12 }
 0x718   : > { %2533 = shalt.err (!%p2530_p8)
}
 0x719   : > { %2111 = dma.vmem_to_hbm [thread:$0]  (%p3142_p9), %s3035_s28, 128, %s3033_s23, %s1586_s18   ;;  %v2076_v63 = vpop.f32.mrf.mxu1 }
 0x71a PF: > { %p2163_p6 = scmp.ge.s32.totalorder %s2588_s27, 2  ;;  %s1611_s5 = sand.u32 1, %s2576_s24  }
 0x71b   : > { %p3143_p0 = scmp.ne.s32.totalorder %s3126_s16, 0  ;;  %s1612_s29 = scalar_lea.sflag [#allocation4], %s1611_s5 }
 0x71d   : > { %p2143_p2 = pnand %p2163_p6, %p3143_p0 }
 0x71f   : > { %p2144_p1 = pneg %p2143_p2 }
 0x721   : > { %2571 = dma.done.wait (%p2144_p1), %s1612_s29, 128  }
 0x722   : > { %2573 = vsyncadd (%p2144_p1), %s1612_s29, 4294967168  ;;  %s3144_s20 = sld [smem:[#allocation24_spill]]  ;;  %p34_p3 = scmp.ge.s32.totalorder %s2834_s22, 5  }
 0x723   : > { %s3145_s24 = smov %s2580_s25  ;;  %s3146_s25 = smov %s2584_s26 }
 0x724   : > { %s3148_s27 = smov %s2834_s22  ;;  %36 = sbr.rel (!%p34_p3) target bundleno = 22 (0x16), region = 165 }
 0x728   : > { %s3147_s26 = smov %s3144_s20 }
 0x729   :  { %1617 = vsyncpa [#allocation3], 1 }
 0x72a   :  { %1619 = vsyncpa [#allocation3 + $0x1], 1 }
 0x72b   :  { %1620 = vsyncpa [#allocation6], 1 }
 0x72c   :  { %1621 = vsyncpa [#allocation9], 1 }
 0x72d   :  { %1622 = vsyncpa [#allocation12], 1 }
 0x72e   :  { %1623 = vsyncpa [#allocation15], 1 }
 0x72f   :  { %1624 = vsyncpa [#allocation4], 1 }
 0x730   :  { %1626 = vsyncpa [#allocation4 + $0x1], 1 }

</bundles_post_ra>
